<compile_context>
chip_gen: v6e
topology: v6e:2x2x1
jax: 0.10.0
libtpu: 0.0.40
codegen_flags: <defaults>
</compile_context>

<pallas_src>
import functools

import jax
import jax.numpy as jnp
from jax import lax
from jax.experimental import pallas as pl
from jax.experimental.pallas import tpu as pltpu


def _round_up(x, m):
    return (x + m - 1) // m * m


def _supcon_kernel(*refs, na, nc, nc_pad, ta, tc, loss_scale, has_keys):
    if has_keys:
        (akey_ref, ckey_ref, a_ref, ct_ref, out_ref,
         m_scr, l_scr, s_scr, n_scr) = refs
    else:
        (mask_ref, a_ref, ct_ref, out_ref,
         m_scr, l_scr, s_scr, n_scr) = refs

    i = pl.program_id(0)
    kc = pl.program_id(1)
    num_c = pl.num_programs(1)

    # --- once per anchor tile: reset online-softmax / positive-pair state ---
    @pl.when(kc == 0)
    def _init():
        m_scr[...] = jnp.full(m_scr.shape, -1e30, jnp.float32)
        l_scr[...] = jnp.zeros(l_scr.shape, jnp.float32)
        s_scr[...] = jnp.zeros(s_scr.shape, jnp.float32)
        n_scr[...] = jnp.zeros(n_scr.shape, jnp.float32)

    # MXU: [ta, K] @ [K, tc]; operands are pre-normalized, 1/T is folded into the
    # anchors, both cast in the wrapper. bf16 x bf16 -> f32 accumulation, no transpose.
    logits = lax.dot_general(a_ref[...], ct_ref[...], (((1,), (0,)), ((), ())),
                             preferred_element_type=jnp.float32)

    if has_keys:
        pos_raw = akey_ref[...] == ckey_ref[...]     # (ta,1)==(1,tc) -> (ta,tc) bool

    # Scalar predicates: does this tile need the diagonal / column-padding masks?
    row0 = i * ta
    col0 = kc * tc
    diag_hit = jnp.logical_and(row0 < col0 + tc, col0 < row0 + ta)
    if nc_pad > nc:                                   # static: padding exists at all?
        needs_mask = jnp.logical_or(diag_hit, kc == num_c - 1)
    else:
        needs_mask = diag_hit

    @pl.when(jnp.logical_not(needs_mask))
    def _fast():   # interior tile: no diagonal, no padded columns -> no mask work
        m_old = m_scr[...]
        m_new = jnp.maximum(m_old, jnp.max(logits, axis=1, keepdims=True))
        e = jnp.exp(logits - m_new)
        if has_keys:
            s_upd = jnp.sum(jnp.where(pos_raw, logits, 0.0), axis=1, keepdims=True)
            n_upd = jnp.sum(jnp.where(pos_raw, 1.0, 0.0), axis=1, keepdims=True)
        else:
            m_t = mask_ref[...].astype(jnp.float32)
            s_upd = jnp.sum(m_t * logits, axis=1, keepdims=True)
            n_upd = jnp.sum(m_t, axis=1, keepdims=True)
        l_scr[...] = jnp.exp(m_old - m_new) * l_scr[...] + jnp.sum(
            e, axis=1, keepdims=True)
        m_scr[...] = m_new
        s_scr[...] += s_upd
        n_scr[...] += n_upd

    @pl.when(needs_mask)
    def _slow():   # tile touches the diagonal and/or padded contrast columns
        row_g = row0 + lax.broadcasted_iota(jnp.int32, (ta, tc), 0)
        col_g = col0 + lax.broadcasted_iota(jnp.int32, (ta, tc), 1)
        col_valid = col_g < nc
        lm = jnp.logical_and(col_valid, row_g != col_g)          # logits_mask
        m_old = m_scr[...]
        m_blk = jnp.max(jnp.where(col_valid, logits, -1e30), axis=1, keepdims=True)
        m_new = jnp.maximum(m_old, m_blk)
        e = jnp.where(lm, jnp.exp(logits - m_new), 0.0)
        if has_keys:
            pos_b = jnp.logical_and(lm, pos_raw)
            s_upd = jnp.sum(jnp.where(pos_b, logits, 0.0), axis=1, keepdims=True)
            n_upd = jnp.sum(jnp.where(pos_b, 1.0, 0.0), axis=1, keepdims=True)
        else:
            pos = jnp.where(lm, mask_ref[...].astype(jnp.float32), 0.0)
            s_upd = jnp.sum(pos * logits, axis=1, keepdims=True)
            n_upd = jnp.sum(pos, axis=1, keepdims=True)
        l_scr[...] = jnp.exp(m_old - m_new) * l_scr[...] + jnp.sum(
            e, axis=1, keepdims=True)
        m_scr[...] = m_new
        s_scr[...] += s_upd
        n_scr[...] += n_upd

    # --- finalize: per-anchor-tile partial loss sum, lane-dense store ---
    @pl.when(kc == num_c - 1)
    def _finalize():
        log_denom = m_scr[...] + jnp.log(l_scr[...])
        cnt = n_scr[...]
        cnt_safe = jnp.where(cnt < 1e-6, 1.0, cnt)
        mean_log_prob = (s_scr[...] - cnt * log_denom) / cnt_safe   # exact divide
        loss_row = loss_scale * mean_log_prob                       # -(T/base_T) * mlp
        row_l = row0 + lax.broadcasted_iota(jnp.int32, (ta, 1), 0)
        loss_row = jnp.where(row_l < na, loss_row, 0.0)             # drop padded rows
        partial = jnp.sum(loss_row, axis=0, keepdims=True)          # (1, 1)
        out_ref[...] = jnp.broadcast_to(partial, out_ref.shape)     # unmasked (8,128) vst


def supcon_loss(features, labels=None, mask=None, *, temperature=0.07,
                contrast_mode='all', base_temperature=0.07,
                block_a=256, block_c=1024, mxu_dtype=jnp.bfloat16,
                vmem_limit_bytes=48 * 1024 * 1024):
    """JAX/Pallas port of SupConLoss.forward (forward only). Returns scalar f32 loss.

    Chip notes: block_c=1024 keeps the contrast tile resident for moderate batches
    (best on v5e/v6e) while staying inside v7x's 64 MiB/TC with the default 48 MiB
    vmem budget; raise block_c / vmem_limit_bytes on v5e/v6e for very large batches.
    mxu_dtype=jnp.float32 gives an exact-precision fallback (matmul is tiny)."""
    if block_a % 16 != 0 or block_c % 16 != 0:
        raise ValueError('block_a / block_c must be multiples of 16')

    features = jnp.asarray(features, jnp.float32)
    if features.ndim < 3:
        raise ValueError('`features` needs to be [bsz, n_views, ...]')
    if features.ndim > 3:
        features = features.reshape(features.shape[0], features.shape[1], -1)
    bsz, n_views, dim = features.shape

    if labels is not None and mask is not None:
        raise ValueError('Cannot define both `labels` and `mask`')

    # F.normalize(features, dim=-1) hoisted to the wrapper (runs once, in XLA).
    feat_n = features / jnp.maximum(
        jnp.linalg.norm(features, axis=-1, keepdims=True), 1e-12)
    # torch.cat(torch.unbind(features, dim=1), dim=0): view-major stacking
    contrast_feature = jnp.transpose(feat_n, (1, 0, 2)).reshape(n_views * bsz, dim)
    if contrast_mode == 'one':
        anchor_feature, anchor_count = contrast_feature[:bsz], 1
    elif contrast_mode == 'all':
        anchor_feature, anchor_count = contrast_feature, n_views
    else:
        raise ValueError('Unknown mode: {}'.format(contrast_mode))

    na, nc = anchor_feature.shape[0], contrast_feature.shape[0]

    # Tile sizes. Anchor ("parallel") axis: use >= 2 tiles whenever possible so both
    # v7x TensorCores get work. Contrast axis: single resident tile when it fits
    # block_c, otherwise 128-lane-aligned tiles.
    if na <= block_a:
        ta = _round_up((na + 1) // 2, 16) if na > 16 else _round_up(na, 16)
    else:
        ta = block_a
    if nc <= block_c:
        tc = _round_up(nc, 16)
    else:
        tc = block_c
        if tc % 128 != 0:
            raise ValueError(
                'block_c must be a multiple of 128 when the contrast dim is tiled')
    na_pad, nc_pad = _round_up(na, ta), _round_up(nc, tc)
    num_a, num_c = na_pad // ta, nc_pad // tc

    # Fold 1/temperature into the anchors, cast both MXU operands, pad only the
    # batch axes (feature dim stays at its natural size), pre-transpose the contrast
    # so the kernel contraction is a plain A @ B (no in-kernel RHS transpose).
    a_mxu = (anchor_feature * (1.0 / float(temperature))).astype(mxu_dtype)
    c_mxu = contrast_feature.astype(mxu_dtype)
    a_pad = jnp.pad(a_mxu, ((0, na_pad - na), (0, 0)))              # (na_pad, dim)
    ct_pad = jnp.pad(c_mxu.T, ((0, 0), (0, nc_pad - nc)))           # (dim, nc_pad)

    has_keys = mask is None
    if has_keys:
        if labels is None:
            base_key = jnp.arange(bsz, dtype=jnp.int32)             # SimCLR: eye(bsz)
        else:
            labels = jnp.asarray(labels).reshape(-1)
            if labels.shape[0] != bsz:
                raise ValueError('Num of labels does not match num of features')
            base_key = labels.astype(jnp.int32)
        ckeys = jnp.tile(base_key, n_views)                         # key of contrast row
        akeys = ckeys[:na]                                          # 'one' -> first bsz
        akeys = jnp.pad(akeys, (0, na_pad - na)).reshape(na_pad, 1)
        ckeys = jnp.pad(ckeys, (0, nc_pad - nc)).reshape(1, nc_pad)
        inputs = (akeys, ckeys, a_pad, ct_pad)
        in_specs = [
            pl.BlockSpec((ta, 1), lambda i, k: (i, 0)),
            pl.BlockSpec((1, tc), lambda i, k: (0, k)),
            pl.BlockSpec((ta, dim), lambda i, k: (i, 0)),
            pl.BlockSpec((dim, tc), lambda i, k: (0, k)),
        ]
    else:
        # User-supplied (possibly asymmetric / non-binary) mask: dense-tile path.
        # bf16 tiles halve the largest per-step DMA (exact for 0/1 masks); widened
        # to f32 inside the kernel.
        mask = jnp.asarray(mask, jnp.float32)
        big_mask = jnp.tile(mask, (anchor_count, n_views)).astype(jnp.bfloat16)
        big_mask = jnp.pad(big_mask, ((0, na_pad - na), (0, nc_pad - nc)))
        inputs = (big_mask, a_pad, ct_pad)
        in_specs = [
            pl.BlockSpec((ta, tc), lambda i, k: (i, k)),
            pl.BlockSpec((ta, dim), lambda i, k: (i, 0)),
            pl.BlockSpec((dim, tc), lambda i, k: (0, k)),
        ]

    kernel = functools.partial(
        _supcon_kernel, na=na, nc=nc, nc_pad=nc_pad, ta=ta, tc=tc,
        loss_scale=-(float(temperature) / float(base_temperature)),
        has_keys=has_keys)

    out = pl.pallas_call(
        kernel,
        out_shape=jax.ShapeDtypeStruct((num_a * 8, 128), jnp.float32),
        grid=(num_a, num_c),
        in_specs=in_specs,
        out_specs=pl.BlockSpec((8, 128), lambda i, k: (i, 0)),
        scratch_shapes=[
            pltpu.VMEM((ta, 1), jnp.float32),   # running max m
            pltpu.VMEM((ta, 1), jnp.float32),   # running l = sum exp(logit - m)
            pltpu.VMEM((ta, 1), jnp.float32),   # sum over positives of raw logits
            pltpu.VMEM((ta, 1), jnp.float32),   # positive-pair count
        ],
        compiler_params=pltpu.CompilerParams(
            dimension_semantics=("parallel", "arbitrary"),
            vmem_limit_bytes=vmem_limit_bytes),
    )(*inputs)

    # Final scalar mean over the real (unpadded) anchors, done by XLA.
    return jnp.sum(out[0::8, 0]) / na


def _supcon_loss_ref(features, labels=None, mask=None, *, temperature=0.07,
                     contrast_mode='all', base_temperature=0.07, bf16_matmul=False):
    """Pure-JAX reference mirroring the PyTorch module. bf16_matmul=True mirrors the
    kernel's precision choices (bf16 MXU operands with 1/T folded in, f32 accum)."""
    f = jnp.asarray(features, jnp.float32)
    if f.ndim > 3:
        f = f.reshape(f.shape[0], f.shape[1], -1)
    bsz, n_views, dim = f.shape
    f = f / jnp.maximum(jnp.linalg.norm(f, axis=-1, keepdims=True), 1e-12)
    if labels is None and mask is None:
        mask = jnp.eye(bsz, dtype=jnp.float32)
    elif labels is not None:
        labels = jnp.asarray(labels).reshape(-1, 1)
        mask = (labels == labels.T).astype(jnp.float32)
    else:
        mask = jnp.asarray(mask, jnp.float32)
    contrast = jnp.transpose(f, (1, 0, 2)).reshape(n_views * bsz, dim)
    if contrast_mode == 'one':
        anchor, anchor_count = contrast[:bsz], 1
    else:
        anchor, anchor_count = contrast, n_views
    if bf16_matmul:
        a = (anchor / temperature).astype(jnp.bfloat16)
        logits = jnp.dot(a, contrast.astype(jnp.bfloat16).T,
                         preferred_element_type=jnp.float32)
    else:
        logits = anchor @ contrast.T / temperature
    logits = logits - jnp.max(logits, axis=1, keepdims=True)
    mask = jnp.tile(mask, (anchor_count, n_views))
    na, nc = mask.shape
    logits_mask = 1.0 - jnp.eye(na, nc, dtype=jnp.float32)
    mask = mask * logits_mask
    exp_logits = jnp.exp(logits) * logits_mask
    log_prob = logits - jnp.log(jnp.sum(exp_logits, axis=1, keepdims=True))
    pos = jnp.sum(mask, axis=1)
    pos = jnp.where(pos < 1e-6, 1.0, pos)
    mean_log_prob_pos = jnp.sum(mask * log_prob, axis=1) / pos
    return jnp.mean(-(temperature / base_temperature) * mean_log_prob_pos)


if __name__ == "__main__":
    key = jax.random.PRNGKey(0)
    k1, k2, k3 = jax.random.split(key, 3)

    bsz, n_views, dim = 8, 2, 32
    feats = jax.random.normal(k1, (bsz, n_views, dim), dtype=jnp.float32)
    labels = jax.random.randint(k2, (bsz,), 0, 3)

    def check(got, **ref_kwargs):
        mirrored = _supcon_loss_ref(bf16_matmul=True, **ref_kwargs)   # kernel precision
        exact = _supcon_loss_ref(bf16_matmul=False, **ref_kwargs)     # full f32 torch math
        assert jnp.allclose(got, mirrored, atol=1e-2, rtol=1e-2), (got, mirrored)
        assert jnp.allclose(got, exact, atol=5e-2, rtol=5e-2), (got, exact)

    # supervised (labels), contrast_mode='all'
    loss_sup = jax.block_until_ready(supcon_loss(feats, labels=labels))
    check(loss_sup, features=feats, labels=labels)

    # unsupervised SimCLR path (labels=None, mask=None)
    loss_unsup = jax.block_until_ready(supcon_loss(feats))
    check(loss_unsup, features=feats)

    # contrast_mode='one'
    loss_one = jax.block_until_ready(
        supcon_loss(feats, labels=labels, contrast_mode='one'))
    check(loss_one, features=feats, labels=labels, contrast_mode='one')

    # explicit dense-mask path (should agree with the labels path)
    msk = (labels[:, None] == labels[None, :]).astype(jnp.float32)
    loss_msk = jax.block_until_ready(supcon_loss(feats, mask=msk))
    assert jnp.allclose(loss_msk, loss_sup, atol=1e-5, rtol=1e-5), (loss_msk, loss_sup)

    # Larger problem with small blocks: exercises multi-tile online softmax, the
    # interior fast path, the padded last contrast tile, and multiple anchor tiles.
    bsz2 = 80
    feats2 = jax.random.normal(k3, (bsz2, n_views, dim), dtype=jnp.float32)
    labels2 = jnp.arange(bsz2, dtype=jnp.int32) % 5
    loss_big = jax.block_until_ready(
        supcon_loss(feats2, labels=labels2, block_a=64, block_c=128))
    check(loss_big, features=feats2, labels=labels2)

    print("KERNEL_OK")
</pallas_src>

<mosaic_0001>
module attributes {stable_mosaic.version = 11 : i64} {
  func.func @_supcon_kernel(%arg0: i32, %arg1: i32, %arg2: memref<16x1xi32, #tpu.memory_space<vmem>>, %arg3: memref<1x16xi32, #tpu.memory_space<vmem>>, %arg4: memref<16x32xbf16, #tpu.memory_space<vmem>>, %arg5: memref<32x16xbf16, #tpu.memory_space<vmem>>, %arg6: memref<8x128xf32, #tpu.memory_space<vmem>>, %arg7: memref<16x1xf32, #tpu.memory_space<vmem>>, %arg8: memref<16x1xf32, #tpu.memory_space<vmem>>, %arg9: memref<16x1xf32, #tpu.memory_space<vmem>>, %arg10: memref<16x1xf32, #tpu.memory_space<vmem>>) attributes {dimension_semantics = [#tpu.dimension_semantics<parallel>, #tpu.dimension_semantics<arbitrary>], iteration_bounds = array<i64: 1, 1>, scalar_prefetch = 0 : i64, scratch_operands = 4 : i64, tpu.core_type = #tpu.core_type<tc>, window_params = [{transform_indices = @transform_0, window_bounds = array<i64: 16, 1>}, {transform_indices = @transform_1, window_bounds = array<i64: 1, 16>}, {transform_indices = @transform_2, window_bounds = array<i64: 16, 32>}, {transform_indices = @transform_3, window_bounds = array<i64: 32, 16>}, {transform_indices = @transform_4, window_bounds = array<i64: 8, 128>}]} {
    %c0_i32 = arith.constant 0 : i32
    %0 = arith.cmpi eq, %arg1, %c0_i32 : i32
    %1 = arith.extui %0 : i1 to i32
    %c0_i32_0 = arith.constant 0 : i32
    %2 = arith.cmpi ne, %1, %c0_i32_0 : i32
    scf.if %2 {
      %cst_15 = arith.constant -1.000000e+30 : f32
      %26 = vector.broadcast %cst_15 : f32 to vector<16x1xf32>
      %c0_16 = arith.constant 0 : index
      %c0_17 = arith.constant 0 : index
      %27 = vector.load %arg7[%c0_16, %c0_17] : memref<16x1xf32, #tpu.memory_space<vmem>>, vector<16x1xf32>
      tpu.vector_store %arg7[%c0_16, %c0_17], %26 {strides = array<i32>} : memref<16x1xf32, #tpu.memory_space<vmem>>, vector<16x1xf32>,
      %cst_18 = arith.constant 0.000000e+00 : f32
      %28 = vector.broadcast %cst_18 : f32 to vector<16x1xf32>
      %c0_19 = arith.constant 0 : index
      %c0_20 = arith.constant 0 : index
      %29 = vector.load %arg8[%c0_19, %c0_20] : memref<16x1xf32, #tpu.memory_space<vmem>>, vector<16x1xf32>
      tpu.vector_store %arg8[%c0_19, %c0_20], %28 {strides = array<i32>} : memref<16x1xf32, #tpu.memory_space<vmem>>, vector<16x1xf32>,
      %cst_21 = arith.constant 0.000000e+00 : f32
      %30 = vector.broadcast %cst_21 : f32 to vector<16x1xf32>
      %c0_22 = arith.constant 0 : index
      %c0_23 = arith.constant 0 : index
      %31 = vector.load %arg9[%c0_22, %c0_23] : memref<16x1xf32, #tpu.memory_space<vmem>>, vector<16x1xf32>
      tpu.vector_store %arg9[%c0_22, %c0_23], %30 {strides = array<i32>} : memref<16x1xf32, #tpu.memory_space<vmem>>, vector<16x1xf32>,
      %cst_24 = arith.constant 0.000000e+00 : f32
      %32 = vector.broadcast %cst_24 : f32 to vector<16x1xf32>
      %c0_25 = arith.constant 0 : index
      %c0_26 = arith.constant 0 : index
      %33 = vector.load %arg10[%c0_25, %c0_26] : memref<16x1xf32, #tpu.memory_space<vmem>>, vector<16x1xf32>
      tpu.vector_store %arg10[%c0_25, %c0_26], %32 {strides = array<i32>} : memref<16x1xf32, #tpu.memory_space<vmem>>, vector<16x1xf32>,
    } else {
    }
    %c0 = arith.constant 0 : index
    %c0_1 = arith.constant 0 : index
    %3 = vector.load %arg4[%c0, %c0_1] : memref<16x32xbf16, #tpu.memory_space<vmem>>, vector<16x32xbf16>
    %c0_2 = arith.constant 0 : index
    %c0_3 = arith.constant 0 : index
    %4 = vector.load %arg5[%c0_2, %c0_3] : memref<32x16xbf16, #tpu.memory_space<vmem>>, vector<32x16xbf16>
    %cst = arith.constant dense<0.000000e+00> : vector<16x16xf32>
    %5 = tpu.matmul %3, %4, %cst {dimension_numbers = #tpu.dot_dimension_numbers<[1], [0], [0], [1], [0, 0, 1, 1], [], []>} : vector<16x32xbf16>, vector<32x16xbf16>, vector<16x16xf32> -> vector<16x16xf32>
    %c0_4 = arith.constant 0 : index
    %c0_5 = arith.constant 0 : index
    %6 = vector.load %arg2[%c0_4, %c0_5] : memref<16x1xi32, #tpu.memory_space<vmem>>, vector<16x1xi32>
    %c0_6 = arith.constant 0 : index
    %c0_7 = arith.constant 0 : index
    %7 = vector.load %arg3[%c0_6, %c0_7] : memref<1x16xi32, #tpu.memory_space<vmem>>, vector<1x16xi32>
    %8 = vector.broadcast %6 : vector<16x1xi32> to vector<16x16xi32>
    %9 = vector.broadcast %7 : vector<1x16xi32> to vector<16x16xi32>
    %10 = arith.cmpi eq, %8, %9 : vector<16x16xi32>
    %c16_i32 = arith.constant 16 : i32
    %11 = arith.muli %arg0, %c16_i32 : i32
    %c16_i32_8 = arith.constant 16 : i32
    %12 = arith.muli %arg1, %c16_i32_8 : i32
    %c16_i32_9 = arith.constant 16 : i32
    %13 = arith.addi %12, %c16_i32_9 : i32
    %14 = arith.cmpi slt, %11, %13 : i32
    %c16_i32_10 = arith.constant 16 : i32
    %15 = arith.addi %11, %c16_i32_10 : i32
    %16 = arith.cmpi slt, %12, %15 : i32
    %17 = arith.andi %14, %16 : i1
    %true = arith.constant true
    %18 = arith.xori %17, %true : i1
    %19 = arith.extui %18 : i1 to i32
    %c0_i32_11 = arith.constant 0 : i32
    %20 = arith.cmpi ne, %19, %c0_i32_11 : i32
    scf.if %20 {
      %c0_15 = arith.constant 0 : index
      %c0_16 = arith.constant 0 : index
      %26 = vector.load %arg7[%c0_15, %c0_16] : memref<16x1xf32, #tpu.memory_space<vmem>>, vector<16x1xf32>
      %cst_17 = arith.constant dense<0xFF800000> : vector<16xf32>
      %27 = vector.multi_reduction <maximumf>, %5, %cst_17 [1] : vector<16x16xf32> to vector<16xf32>
      %28 = vector.shape_cast %27 : vector<16xf32> to vector<16x1xf32>
      %29 = arith.maximumf %26, %28 : vector<16x1xf32>
      %30 = vector.broadcast %29 : vector<16x1xf32> to vector<16x16xf32>
      %31 = arith.subf %5, %30 : vector<16x16xf32>
      %32 = math.exp %31 : vector<16x16xf32>
      %cst_18 = arith.constant 0.000000e+00 : f32
      %33 = vector.broadcast %cst_18 : f32 to vector<16x16xf32>
      %34 = arith.select %10, %5, %33 : vector<16x16xi1>, vector<16x16xf32>
      %cst_19 = arith.constant dense<0.000000e+00> : vector<16xf32>
      %35 = vector.multi_reduction <add>, %34, %cst_19 [1] : vector<16x16xf32> to vector<16xf32>
      %36 = vector.shape_cast %35 : vector<16xf32> to vector<16x1xf32>
      %cst_20 = arith.constant 1.000000e+00 : f32
      %cst_21 = arith.constant 0.000000e+00 : f32
      %37 = vector.broadcast %cst_20 : f32 to vector<16x16xf32>
      %38 = vector.broadcast %cst_21 : f32 to vector<16x16xf32>
      %39 = arith.select %10, %37, %38 : vector<16x16xi1>, vector<16x16xf32>
      %cst_22 = arith.constant dense<0.000000e+00> : vector<16xf32>
      %40 = vector.multi_reduction <add>, %39, %cst_22 [1] : vector<16x16xf32> to vector<16xf32>
      %41 = vector.shape_cast %40 : vector<16xf32> to vector<16x1xf32>
      %42 = arith.subf %26, %29 : vector<16x1xf32>
      %43 = math.exp %42 : vector<16x1xf32>
      %c0_23 = arith.constant 0 : index
      %c0_24 = arith.constant 0 : index
      %44 = vector.load %arg8[%c0_23, %c0_24] : memref<16x1xf32, #tpu.memory_space<vmem>>, vector<16x1xf32>
      %45 = arith.mulf %43, %44 : vector<16x1xf32>
      %cst_25 = arith.constant dense<0.000000e+00> : vector<16xf32>
      %46 = vector.multi_reduction <add>, %32, %cst_25 [1] : vector<16x16xf32> to vector<16xf32>
      %47 = vector.shape_cast %46 : vector<16xf32> to vector<16x1xf32>
      %48 = arith.addf %45, %47 : vector<16x1xf32>
      %c0_26 = arith.constant 0 : index
      %c0_27 = arith.constant 0 : index
      %49 = vector.load %arg8[%c0_26, %c0_27] : memref<16x1xf32, #tpu.memory_space<vmem>>, vector<16x1xf32>
      tpu.vector_store %arg8[%c0_26, %c0_27], %48 {strides = array<i32>} : memref<16x1xf32, #tpu.memory_space<vmem>>, vector<16x1xf32>,
      %c0_28 = arith.constant 0 : index
      %c0_29 = arith.constant 0 : index
      %50 = vector.load %arg7[%c0_28, %c0_29] : memref<16x1xf32, #tpu.memory_space<vmem>>, vector<16x1xf32>
      tpu.vector_store %arg7[%c0_28, %c0_29], %29 {strides = array<i32>} : memref<16x1xf32, #tpu.memory_space<vmem>>, vector<16x1xf32>,
      %c0_30 = arith.constant 0 : index
      %c0_31 = arith.constant 0 : index
      %51 = vector.load %arg9[%c0_30, %c0_31] : memref<16x1xf32, #tpu.memory_space<vmem>>, vector<16x1xf32>
      %52 = arith.addf %51, %36 : vector<16x1xf32>
      %c0_32 = arith.constant 0 : index
      %c0_33 = arith.constant 0 : index
      %53 = vector.load %arg9[%c0_32, %c0_33] : memref<16x1xf32, #tpu.memory_space<vmem>>, vector<16x1xf32>
      tpu.vector_store %arg9[%c0_32, %c0_33], %52 {strides = array<i32>} : memref<16x1xf32, #tpu.memory_space<vmem>>, vector<16x1xf32>,
      %c0_34 = arith.constant 0 : index
      %c0_35 = arith.constant 0 : index
      %54 = vector.load %arg10[%c0_34, %c0_35] : memref<16x1xf32, #tpu.memory_space<vmem>>, vector<16x1xf32>
      %55 = arith.addf %54, %41 : vector<16x1xf32>
      %c0_36 = arith.constant 0 : index
      %c0_37 = arith.constant 0 : index
      %56 = vector.load %arg10[%c0_36, %c0_37] : memref<16x1xf32, #tpu.memory_space<vmem>>, vector<16x1xf32>
      tpu.vector_store %arg10[%c0_36, %c0_37], %55 {strides = array<i32>} : memref<16x1xf32, #tpu.memory_space<vmem>>, vector<16x1xf32>,
    } else {
    }
    %21 = arith.extui %17 : i1 to i32
    %c0_i32_12 = arith.constant 0 : i32
    %22 = arith.cmpi ne, %21, %c0_i32_12 : i32
    scf.if %22 {
      %26 = tpu.iota {dimensions = array<i32: 0>} : vector<16x16xi32>
      %27 = vector.broadcast %11 : i32 to vector<16x16xi32>
      %28 = arith.addi %27, %26 : vector<16x16xi32>
      %29 = tpu.iota {dimensions = array<i32: 1>} : vector<16x16xi32>
      %30 = vector.broadcast %12 : i32 to vector<16x16xi32>
      %31 = arith.addi %30, %29 : vector<16x16xi32>
      %c16_i32_15 = arith.constant 16 : i32
      %32 = vector.broadcast %c16_i32_15 : i32 to vector<16x16xi32>
      %33 = arith.cmpi slt, %31, %32 : vector<16x16xi32>
      %34 = arith.cmpi ne, %28, %31 : vector<16x16xi32>
      %35 = arith.andi %33, %34 : vector<16x16xi1>
      %c0_16 = arith.constant 0 : index
      %c0_17 = arith.constant 0 : index
      %36 = vector.load %arg7[%c0_16, %c0_17] : memref<16x1xf32, #tpu.memory_space<vmem>>, vector<16x1xf32>
      %cst_18 = arith.constant -1.000000e+30 : f32
      %37 = vector.broadcast %cst_18 : f32 to vector<16x16xf32>
      %38 = arith.select %33, %5, %37 : vector<16x16xi1>, vector<16x16xf32>
      %cst_19 = arith.constant dense<0xFF800000> : vector<16xf32>
      %39 = vector.multi_reduction <maximumf>, %38, %cst_19 [1] : vector<16x16xf32> to vector<16xf32>
      %40 = vector.shape_cast %39 : vector<16xf32> to vector<16x1xf32>
      %41 = arith.maximumf %36, %40 : vector<16x1xf32>
      %42 = vector.broadcast %41 : vector<16x1xf32> to vector<16x16xf32>
      %43 = arith.subf %5, %42 : vector<16x16xf32>
      %44 = math.exp %43 : vector<16x16xf32>
      %cst_20 = arith.constant 0.000000e+00 : f32
      %45 = vector.broadcast %cst_20 : f32 to vector<16x16xf32>
      %46 = arith.select %35, %44, %45 : vector<16x16xi1>, vector<16x16xf32>
      %47 = arith.andi %35, %10 : vector<16x16xi1>
      %cst_21 = arith.constant 0.000000e+00 : f32
      %48 = vector.broadcast %cst_21 : f32 to vector<16x16xf32>
      %49 = arith.select %47, %5, %48 : vector<16x16xi1>, vector<16x16xf32>
      %cst_22 = arith.constant dense<0.000000e+00> : vector<16xf32>
      %50 = vector.multi_reduction <add>, %49, %cst_22 [1] : vector<16x16xf32> to vector<16xf32>
      %51 = vector.shape_cast %50 : vector<16xf32> to vector<16x1xf32>
      %cst_23 = arith.constant 1.000000e+00 : f32
      %cst_24 = arith.constant 0.000000e+00 : f32
      %52 = vector.broadcast %cst_23 : f32 to vector<16x16xf32>
      %53 = vector.broadcast %cst_24 : f32 to vector<16x16xf32>
      %54 = arith.select %47, %52, %53 : vector<16x16xi1>, vector<16x16xf32>
      %cst_25 = arith.constant dense<0.000000e+00> : vector<16xf32>
      %55 = vector.multi_reduction <add>, %54, %cst_25 [1] : vector<16x16xf32> to vector<16xf32>
      %56 = vector.shape_cast %55 : vector<16xf32> to vector<16x1xf32>
      %57 = arith.subf %36, %41 : vector<16x1xf32>
      %58 = math.exp %57 : vector<16x1xf32>
      %c0_26 = arith.constant 0 : index
      %c0_27 = arith.constant 0 : index
      %59 = vector.load %arg8[%c0_26, %c0_27] : memref<16x1xf32, #tpu.memory_space<vmem>>, vector<16x1xf32>
      %60 = arith.mulf %58, %59 : vector<16x1xf32>
      %cst_28 = arith.constant dense<0.000000e+00> : vector<16xf32>
      %61 = vector.multi_reduction <add>, %46, %cst_28 [1] : vector<16x16xf32> to vector<16xf32>
      %62 = vector.shape_cast %61 : vector<16xf32> to vector<16x1xf32>
      %63 = arith.addf %60, %62 : vector<16x1xf32>
      %c0_29 = arith.constant 0 : index
      %c0_30 = arith.constant 0 : index
      %64 = vector.load %arg8[%c0_29, %c0_30] : memref<16x1xf32, #tpu.memory_space<vmem>>, vector<16x1xf32>
      tpu.vector_store %arg8[%c0_29, %c0_30], %63 {strides = array<i32>} : memref<16x1xf32, #tpu.memory_space<vmem>>, vector<16x1xf32>,
      %c0_31 = arith.constant 0 : index
      %c0_32 = arith.constant 0 : index
      %65 = vector.load %arg7[%c0_31, %c0_32] : memref<16x1xf32, #tpu.memory_space<vmem>>, vector<16x1xf32>
      tpu.vector_store %arg7[%c0_31, %c0_32], %41 {strides = array<i32>} : memref<16x1xf32, #tpu.memory_space<vmem>>, vector<16x1xf32>,
      %c0_33 = arith.constant 0 : index
      %c0_34 = arith.constant 0 : index
      %66 = vector.load %arg9[%c0_33, %c0_34] : memref<16x1xf32, #tpu.memory_space<vmem>>, vector<16x1xf32>
      %67 = arith.addf %66, %51 : vector<16x1xf32>
      %c0_35 = arith.constant 0 : index
      %c0_36 = arith.constant 0 : index
      %68 = vector.load %arg9[%c0_35, %c0_36] : memref<16x1xf32, #tpu.memory_space<vmem>>, vector<16x1xf32>
      tpu.vector_store %arg9[%c0_35, %c0_36], %67 {strides = array<i32>} : memref<16x1xf32, #tpu.memory_space<vmem>>, vector<16x1xf32>,
      %c0_37 = arith.constant 0 : index
      %c0_38 = arith.constant 0 : index
      %69 = vector.load %arg10[%c0_37, %c0_38] : memref<16x1xf32, #tpu.memory_space<vmem>>, vector<16x1xf32>
      %70 = arith.addf %69, %56 : vector<16x1xf32>
      %c0_39 = arith.constant 0 : index
      %c0_40 = arith.constant 0 : index
      %71 = vector.load %arg10[%c0_39, %c0_40] : memref<16x1xf32, #tpu.memory_space<vmem>>, vector<16x1xf32>
      tpu.vector_store %arg10[%c0_39, %c0_40], %70 {strides = array<i32>} : memref<16x1xf32, #tpu.memory_space<vmem>>, vector<16x1xf32>,
    } else {
    }
    %c0_i32_13 = arith.constant 0 : i32
    %23 = arith.cmpi eq, %arg1, %c0_i32_13 : i32
    %24 = arith.extui %23 : i1 to i32
    %c0_i32_14 = arith.constant 0 : i32
    %25 = arith.cmpi ne, %24, %c0_i32_14 : i32
    scf.if %25 {
      %c0_15 = arith.constant 0 : index
      %c0_16 = arith.constant 0 : index
      %26 = vector.load %arg7[%c0_15, %c0_16] : memref<16x1xf32, #tpu.memory_space<vmem>>, vector<16x1xf32>
      %c0_17 = arith.constant 0 : index
      %c0_18 = arith.constant 0 : index
      %27 = vector.load %arg8[%c0_17, %c0_18] : memref<16x1xf32, #tpu.memory_space<vmem>>, vector<16x1xf32>
      %28 = math.log %27 : vector<16x1xf32>
      %29 = arith.addf %26, %28 : vector<16x1xf32>
      %c0_19 = arith.constant 0 : index
      %c0_20 = arith.constant 0 : index
      %30 = vector.load %arg10[%c0_19, %c0_20] : memref<16x1xf32, #tpu.memory_space<vmem>>, vector<16x1xf32>
      %cst_21 = arith.constant 9.99999997E-7 : f32
      %31 = vector.broadcast %cst_21 : f32 to vector<16x1xf32>
      %32 = arith.cmpf olt, %30, %31 : vector<16x1xf32>
      %cst_22 = arith.constant 1.000000e+00 : f32
      %33 = vector.broadcast %cst_22 : f32 to vector<16x1xf32>
      %34 = arith.select %32, %33, %30 : vector<16x1xi1>, vector<16x1xf32>
      %c0_23 = arith.constant 0 : index
      %c0_24 = arith.constant 0 : index
      %35 = vector.load %arg9[%c0_23, %c0_24] : memref<16x1xf32, #tpu.memory_space<vmem>>, vector<16x1xf32>
      %36 = arith.mulf %30, %29 : vector<16x1xf32>
      %37 = arith.subf %35, %36 : vector<16x1xf32>
      %38 = arith.divf %37, %34 : vector<16x1xf32>
      %cst_25 = arith.constant -1.000000e+00 : f32
      %39 = vector.broadcast %cst_25 : f32 to vector<16x1xf32>
      %40 = arith.mulf %39, %38 : vector<16x1xf32>
      %41 = tpu.iota {dimensions = array<i32: 0>} : vector<16x1xi32>
      %42 = vector.broadcast %11 : i32 to vector<16x1xi32>
      %43 = arith.addi %42, %41 : vector<16x1xi32>
      %c16_i32_26 = arith.constant 16 : i32
      %44 = vector.broadcast %c16_i32_26 : i32 to vector<16x1xi32>
      %45 = arith.cmpi slt, %43, %44 : vector<16x1xi32>
      %cst_27 = arith.constant 0.000000e+00 : f32
      %46 = vector.broadcast %cst_27 : f32 to vector<16x1xf32>
      %47 = arith.select %45, %40, %46 : vector<16x1xi1>, vector<16x1xf32>
      %cst_28 = arith.constant dense<0.000000e+00> : vector<1xf32>
      %48 = vector.multi_reduction <add>, %47, %cst_28 [0] : vector<16x1xf32> to vector<1xf32>
      %49 = vector.shape_cast %48 : vector<1xf32> to vector<1x1xf32>
      %50 = vector.shape_cast %49 : vector<1x1xf32> to vector<1x1xf32>
      %51 = vector.broadcast %50 : vector<1x1xf32> to vector<8x128xf32>
      %c0_29 = arith.constant 0 : index
      %c0_30 = arith.constant 0 : index
      %52 = vector.load %arg6[%c0_29, %c0_30] : memref<8x128xf32, #tpu.memory_space<vmem>>, vector<8x128xf32>
      tpu.vector_store %arg6[%c0_29, %c0_30], %51 {strides = array<i32>} : memref<8x128xf32, #tpu.memory_space<vmem>>, vector<8x128xf32>,
    } else {
    }
    return
  }
  func.func @transform_0(%arg0: i32, %arg1: i32) -> (i32, i32) {
    %c0_i32 = arith.constant 0 : i32
    %c0_i32_0 = arith.constant 0 : i32
    return %arg0, %c0_i32 : i32, i32
  }
  func.func @transform_1(%arg0: i32, %arg1: i32) -> (i32, i32) {
    %c0_i32 = arith.constant 0 : i32
    %c0_i32_0 = arith.constant 0 : i32
    return %c0_i32, %arg1 : i32, i32
  }
  func.func @transform_2(%arg0: i32, %arg1: i32) -> (i32, i32) {
    %c0_i32 = arith.constant 0 : i32
    %c0_i32_0 = arith.constant 0 : i32
    return %arg0, %c0_i32 : i32, i32
  }
  func.func @transform_3(%arg0: i32, %arg1: i32) -> (i32, i32) {
    %c0_i32 = arith.constant 0 : i32
    %c0_i32_0 = arith.constant 0 : i32
    return %c0_i32, %arg1 : i32, i32
  }
  func.func @transform_4(%arg0: i32, %arg1: i32) -> (i32, i32) {
    %c0_i32 = arith.constant 0 : i32
    %c0_i32_0 = arith.constant 0 : i32
    return %arg0, %c0_i32 : i32, i32
  }
}

</mosaic_0001>

<bundles_post_ra>
// kernel: tpu_custom_call.1
= control target key start
LH: loop header
LB: loop body
LE: loop exit
PB: predicated region body
PF: predicated region fallthrough
CT: control target
= control target key end

     0   :  { %v440_v1 = vmov 0.0   ;;  %vm441_vm0 = vmmov 0   ;;  %s558_s0 = inlined_call_operand.vmem [shape: s32[16,1], index: 0, kind: input, shape index: {}]   ;;  %s559_s1 = inlined_call_operand.vmem [shape: s32[1,16], index: 1, kind: input, shape index: {}]   ;;  %s560_s2 = inlined_call_operand.vmem [shape: bf16[16,32], index: 2, kind: input, shape index: {}]   ;;  %s561_s3 = inlined_call_operand.vmem [shape: bf16[32,16], index: 3, kind: input, shape index: {}]   ;;  %s562_s4 = inlined_call_operand.hbm [shape: f32[8,128], index: 4, kind: output, shape index: {}]  }
   0x1   :  { %v399_v0 = vld [vmem:[%s561_s3 + $0x8] sm:$0xff]   ;;  %384 = vmatprep.subr.bf16.mxu0 %v440_v1  ;;  %v400_v2 = vld [vmem:[%s561_s3] sm:$0xff]   ;;  %388 = vmatprep.mubr.msk.bf16.mxu0 %vm441_vm0, %v440_v1 }
   0x2   :  { %385 = vmatpush3.bf16.msra.mxu0 %v399_v0 }
   0x3   :  { %386 = vmatprep.subr.bf16.mxu0 %v440_v1 }
   0x4   :  { %9 = vsyncpa [#allocation7], 0  ;;  %v401_v3 = vld [vmem:[%s560_s2] sm:$0xff]   ;;  %vm55_vm1 = vcmask 261120   ;;  %v442_v4 = vmov 0   ;;  %v125_v5 = vlaneseq  ;;  %vm144_vm3 = vcmask 130048  }
   0x5   :  { %398 = vset.pattern.permute.xlu0 %v442_v4  ;;  %397 = vset.pattern.permute.xlu1 %v442_v4  ;;  %vm23_vm4 = vcmask 7168   ;;  %v443_v13 = vmov -1e+30   ;;  %v100_v16 = vld [vmem:[%s558_s0] sm:$0xff]  ;;  %v101_v25 = vld [vmem:[%s558_s0 + $0x8] sm:$0xff]  ;;  %s444_s0 = smov [#allocation6]  }
   0x6   :  { %387 = vmatpush3.bf16.msra.mxu0 %v400_v2  ;;  %v132_v6 = vand.u32 127, %v125_v5  ;;  %24 = vst.msk [vmem:[#allocation2] sm:$0xff] %vm23_vm4, %v443_v13  ;;  %25 = vst.msk [vmem:[#allocation2 + $0x8] sm:$0xff] %vm23_vm4, %v443_v13  ;;  %v126_v26 = vshrl.u32 %v125_v5, 7  ;;  %v380_v27 = vld [vmem:[%s559_s1] ss:$0 sm:$0xff] }
   0x7   :  { %26 = vst.msk [vmem:[#allocation3] sm:$0xff] %vm23_vm4, %v440_v1  ;;  %27 = vst.msk [vmem:[#allocation3 + $0x8] sm:$0xff] %vm23_vm4, %v440_v1  ;;  %s368_s1 = sshll.u32 %s444_s0, 4  ;;  %s369_s1 = int_to_ptr.vmem [resolvable:$true] %s368_s1 }
   0x8   :  { %vm135_vm2 = vcmp.lt.s32.totalorder %v132_v6, 16  ;;  %28 = vst.msk [vmem:[#allocation4] sm:$0xff] %vm23_vm4, %v440_v1  ;;  %29 = vst.msk [vmem:[#allocation4 + $0x8] sm:$0xff] %vm23_vm4, %v440_v1  ;;  %vm136_vm5 = vcmp.ne.s32.totalorder %v126_v26, %v132_v6  ;;  %v127_v39 = vadd.s32 8, %v126_v26  ;;  %s418_s25 = scalar_lea.vmem %s369_s1, 128  ;;  %p423_p1 = scmp.lt.s32.totalorder %s369_s1, %s369_s1 }
   0x9   :  { %389 = vmatmul.mubr.msk.bf16.vlgmr.msra.gmra.mxu0 %vm55_vm1, %v401_v3  ;;  %30 = vst.msk [vmem:[#allocation5] sm:$0xff] %vm23_vm4, %v440_v1  ;;  %31 = vst.msk [vmem:[#allocation5 + $0x8] sm:$0xff] %vm23_vm4, %v440_v1  ;;  %p419_p0 = scmp.ne.s32.totalorder %s369_s1, %s418_s25  ;;  %p424_p2 = scmp.lt.s32.totalorder %s418_s25, %s418_s25 }
   0xa   :  { %vm518_vm6 = vmand %vm135_vm2, %vm136_vm5  ;;  %vm137_vm9 = vcmp.ne.s32.totalorder %v127_v39, %v132_v6 }
   0xb   :  { %vm139_vm10 = vmand %vm135_vm2, %vm137_vm9  ;;  %p425_p3 = por %p424_p2, %p423_p1 }
   0xd   :  { %v140_v17 = vld [vmem:[#allocation2] sm:$0xff]  ;;  %v141_v20 = vld [vmem:[#allocation2 + $0x8] sm:$0xff]  ;;  %p426_p4 = pnand %p425_p3, %p419_p0 }
   0xe   :  { %v195_v59 = vld [vmem:[#allocation3] sm:$0xff]  ;;  %v196_v63 = vld [vmem:[#allocation3 + $0x8] sm:$0xff] }
  0x10   :  { %v218_v54 = vld [vmem:[#allocation5] sm:$0xff]  ;;  %v219_v4 = vld [vmem:[#allocation5 + $0x8] sm:$0xff] }
  0xc9   :  { %v482_v7 = vpop.f32.mrf.mxu0 }
  0xca   :  { %v142_v8 = vsel %vm135_vm2, %v482_v7, -1e+30 }
  0xcb   :  { %v390_v9 = vpop.f32.mrf.mxu0  ;;  %v145_v10 = vsel %vm144_vm3, %v142_v8, -inf  ;;  %v212_v8 = vld [vmem:[#allocation4] sm:$0xff] }
  0xcc   :  { %146 = vmax.xlane.f32.xlu0 %v145_v10 }
  0xcd   :  { %v487_v11 = vpop.f32.mrf.mxu0 }
  0xce   :  { %v143_v12 = vsel %vm135_vm2, %v487_v11, -1e+30 }
  0xcf   :  { %v391_v14 = vpop.f32.mrf.mxu0  ;;  %v148_v15 = vsel %vm144_vm3, %v143_v12, -inf  ;;  %v213_v12 = vld [vmem:[#allocation4 + $0x8] sm:$0xff] }
  0xd0   :  { %149 = vmax.xlane.f32.xlu0 %v148_v15 }
  0xe6   :  { %104 = vperm.xlu0 %398, %v100_v16  }
 0x155   :  { %v147_v18 = vpop.xlane.xlu0 %146 }
 0x156   :  { %v151_v19 = vmax.f32 %v140_v17, %v147_v18 }
 0x158   :  { %v189_v21 = vsub.f32 %v140_v17, %v151_v19  ;;  %210 = vst.msk [vmem:[#allocation2] sm:$0xff] %vm23_vm4, %v151_v19  ;;  %155 = vperm.xlu1 %397, %v151_v19  }
 0x159   :  { %v150_v22 = vpop.xlane.xlu0 %149 }
 0x15a   :  { %v152_v23 = vmax.f32 %v141_v20, %v150_v22  ;;  %v191_v56 = vmul.f32 1.442695, %v189_v21 }
 0x15c   :  { %v190_v24 = vsub.f32 %v141_v20, %v152_v23  ;;  %211 = vst.msk [vmem:[#allocation2 + $0x8] sm:$0xff] %vm23_vm4, %v152_v23  ;;  %160 = vperm.xlu1 %397, %v152_v23  }
 0x15e   :  { %v193_v57 = vmul.f32 1.442695, %v190_v24 }
 0x15f   :  { %v308_v21 = vld [vmem:[#allocation2] sm:$0xff] }
 0x160   :  { %107 = vperm.xlu1 %397, %v101_v25  }
 0x161   :  { %v105_v28 = vpop.permute.xlu0 %104 }
 0x162   :  { %vm113_vm7 = vcmp.eq.s32.totalorder %v105_v28, %v380_v27 }
 0x163   :  { %vm524_vm8 = vmand %vm518_vm6, %vm113_vm7 }
 0x164   :  { %v181_v31 = vsel %vm524_vm8, 1.0, %v440_v1  ;;  %v173_v49 = vsel %vm524_vm8, %v482_v7, 0.0 }
 0x165   :  { %v183_v32 = vsel %vm144_vm3, %v181_v31, 0.0  ;;  %v175_v50 = vsel %vm144_vm3, %v173_v49, 0.0 }
 0x166   :  { %184 = vadd.xlane.f32.xlu0 %v183_v32 }
 0x1d3   :  { %v156_v33 = vpop.permute.xlu1 %155 }
 0x1d4   :  { %v163_v34 = vsub.f32 %v482_v7, %v156_v33 }
 0x1d6   :  { %v165_v35 = vmul.f32 1.442695, %v163_v34 }
 0x1d7   :  { %v161_v36 = vpop.permute.xlu1 %160 }
 0x1d8   :  { %402 = vpow2.f32 %v165_v35  ;;  %v164_v37 = vsub.f32 %v487_v11, %v161_v36 }
 0x1da   :  { %v167_v38 = vmul.f32 1.442695, %v164_v37 }
 0x1db   :  { %v108_v40 = vpop.permute.xlu1 %107 }
 0x1dc   :  { %404 = vpow2.f32 %v167_v38  ;;  %vm114_vm11 = vcmp.eq.s32.totalorder %v108_v40, %v380_v27  ;;  %v309_v27 = vld [vmem:[#allocation2 + $0x8] sm:$0xff] }
 0x1dd   :  { %vm172_vm12 = vmand %vm139_vm10, %vm114_vm11  ;;  %406 = vpow2.f32 %v191_v56 }
 0x1de   :  { %v182_v47 = vsel %vm172_vm12, 1.0, %v440_v1  ;;  %v174_v51 = vsel %vm172_vm12, %v487_v11, 0.0  ;;  %408 = vpow2.f32 %v193_v57 }
 0x1df   :  { %v186_v48 = vsel %vm144_vm3, %v182_v47, 0.0  ;;  %v178_v52 = vsel %vm144_vm3, %v174_v51, 0.0 }
 0x1e5   :  { %v403_v41 = vpop.eup %402 }
 0x1e6   :  { %v169_v42 = vsel %vm518_vm6, %v403_v41, 0.0 }
 0x1e7   :  { %v199_v43 = vsel %vm144_vm3, %v169_v42, 0.0 }
 0x1e8   :  { %200 = vadd.xlane.f32.xlu1 %v199_v43 }
 0x1e9   :  { %v405_v44 = vpop.eup %404 }
 0x1ea   :  { %v170_v45 = vsel %vm139_vm10, %v405_v44, 0.0  ;;  %v407_v58 = vpop.eup %406 }
 0x1eb   :  { %v202_v46 = vsel %vm144_vm3, %v170_v45, 0.0  ;;  %v197_v60 = vmul.f32 %v407_v58, %v195_v59  ;;  %v409_v61 = vpop.eup %408 }
 0x1ec   :  { %203 = vadd.xlane.f32.xlu1 %v202_v46  ;;  %v198_v1 = vmul.f32 %v409_v61, %v196_v63 }
 0x1ef   :  { %v185_v53 = vpop.xlane.xlu0 %184 }
 0x1f0   :  { %187 = vadd.xlane.f32.xlu1 %v186_v48  ;;  %v220_v55 = vadd.f32 %v218_v54, %v185_v53 }
 0x1f2   :  { %222 = vst.msk [vmem:[#allocation5] sm:$0xff] %vm23_vm4, %v220_v55 }
 0x1f4   :  { %176 = vadd.xlane.f32.xlu1 %v175_v50 }
 0x1f8   :  { %179 = vadd.xlane.f32.xlu1 %v178_v52 }
 0x1f9   :  { %v318_v6 = vld [vmem:[#allocation5] sm:$0xff] }
 0x1fa   :  { %vm320_vm13 = vcmp.lt.f32.partialorder %v318_v6, 1e-06 }
 0x1fb   :  { %v322_v14 = vsel %vm320_vm13, 1.0, %v318_v6 }
 0x271   :  { %v201_v62 = vpop.xlane.xlu1 %200 }
 0x272   :  { %v205_v0 = vadd.f32 %v201_v62, %v197_v60 }
 0x274   :  { %208 = vst.msk [vmem:[#allocation3] sm:$0xff] %vm23_vm4, %v205_v0 }
 0x275   :  { %v204_v2 = vpop.xlane.xlu1 %203 }
 0x276   :  { %v206_v3 = vadd.f32 %v204_v2, %v198_v1 }
 0x278   :  { %209 = vst.msk [vmem:[#allocation3 + $0x8] sm:$0xff] %vm23_vm4, %v206_v3 }
 0x279   :  { %v188_v5 = vpop.xlane.xlu1 %187 }
 0x27a   :  { %v221_v7 = vadd.f32 %v219_v4, %v188_v5 }
 0x27b   :  { %v310_v9 = vld [vmem:[#allocation3] sm:$0xff] }
 0x27c   :  { %223 = vst.msk [vmem:[#allocation5 + $0x8] sm:$0xff] %vm23_vm4, %v221_v7  ;;  %410 = vlog2.f32 %v310_v9 }
 0x27d   :  { %v177_v10 = vpop.xlane.xlu1 %176 }
 0x27e   :  { %v214_v11 = vadd.f32 %v212_v8, %v177_v10 }
 0x27f   :  { %v311_v13 = vld [vmem:[#allocation3 + $0x8] sm:$0xff] }
 0x280   :  { %216 = vst.msk [vmem:[#allocation4] sm:$0xff] %vm23_vm4, %v214_v11  ;;  %412 = vlog2.f32 %v311_v13 }
 0x281   :  { %v180_v15 = vpop.xlane.xlu1 %179  ;;  %414 = vrcp.f32 %v322_v14 }
 0x282   :  { %v215_v16 = vadd.f32 %v213_v12, %v180_v15 }
 0x283   :  { %v319_v17 = vld [vmem:[#allocation5 + $0x8] sm:$0xff] }
 0x284   :  { %217 = vst.msk [vmem:[#allocation4 + $0x8] sm:$0xff] %vm23_vm4, %v215_v16  ;;  %vm321_vm14 = vcmp.lt.f32.partialorder %v319_v17, 1e-06 }
 0x285   :  { %v323_v18 = vsel %vm321_vm14, 1.0, %v319_v17 }
 0x286   :  { %416 = vrcp.f32 %v323_v18 }
 0x287   :  { %v324_v28 = vld [vmem:[#allocation4] sm:$0xff] }
 0x289   :  { %v411_v19 = vpop.eup %410 }
 0x28a   :  { %v313_v20 = vmul.f32 0.6931472, %v411_v19 }
 0x28b   :  { %v325_v33 = vld [vmem:[#allocation4 + $0x8] sm:$0xff] }
 0x28c   :  { %v316_v22 = vadd.f32 %v313_v20, %v308_v21 }
 0x28d   :  { %v413_v23 = vpop.eup %412 }
 0x28e   :  { %v315_v24 = vmul.f32 0.6931472, %v413_v23  ;;  %v326_v25 = vmul.f32 %v318_v6, %v316_v22  ;;  %v415_v26 = vpop.eup %414 }
 0x290   :  { %v317_v29 = vadd.f32 %v315_v24, %v309_v27  ;;  %v328_v30 = vsub.f32 %v324_v28, %v326_v25 }
 0x292   :  { %v327_v31 = vmul.f32 %v319_v17, %v317_v29  ;;  %v331_v32 = vmul.f32 %v415_v26, %v328_v30 }
 0x293   :  { %v417_v35 = vpop.eup %416 }
 0x294   :  { %v329_v34 = vsub.f32 %v325_v33, %v327_v31  ;;  %v334_v37 = vmul.f32 -1.0, %v331_v32 }
 0x296   :  { %v333_v36 = vmul.f32 %v417_v35, %v329_v34  ;;  %v347_v39 = vsel %vm23_vm4, %v334_v37, 0.0 }
 0x298   :  { %v335_v38 = vmul.f32 -1.0, %v333_v36 }
 0x29a   :  { %v348_v40 = vsel %vm23_vm4, %v335_v38, 0.0 }
 0x29b   :  { %v349_v41 = vadd.f32 %v348_v40, %v347_v39 }
 0x29d   :  { %v350_v42 = vrot.slane %v349_v41, 4 }
 0x29f   :  { %v351_v43 = vadd.f32 %v350_v42, %v349_v41 }
 0x2a1   :  { %v352_v44 = vrot.slane %v351_v43, 2 }
 0x2a3   :  { %v353_v45 = vadd.f32 %v352_v44, %v351_v43 }
 0x2a5   :  { %v354_v46 = vrot.slane %v353_v45, 1 }
 0x2a7   :  { %v355_v47 = vadd.f32 %v354_v46, %v353_v45 }
 0x2a9   :  { %358 = vperm.xlu1 %397, %v355_v47  }
 0x324   :  { %v359_v48 = vpop.permute.xlu1 %358 }
 0x325   :  { %361 = vst [vmem:[#allocation6] sm:$0xff] %v359_v48 }
 0x326   :  { %429 = shalt.err (!%p426_p4)
}
 0x327   :  { %371 = dma.vmem_to_hbm [thread:$0]  %s369_s1, 128, %s562_s4, [#allocation7]  }
 0x328   :  { %438 = dma.done.wait [#allocation7], 128  }
 0x329   :  { %439 = vsyncadd [#allocation7], 4294967168 }
 0x32a   :  { %375 = vsyncpa [#allocation7], 1 }

</bundles_post_ra>
